<compile_context>
chip_gen: v7x
topology: tpu7x:2x2x1
jax: 0.10.0
libtpu: 0.0.40
codegen_flags: <defaults>
</compile_context>

<pallas_src>
import functools

import jax
import jax.numpy as jnp
from jax import lax
from jax.experimental import pallas as pl
from jax.experimental.pallas import tpu as pltpu

LANES = 128
CHUNK_ROWS = 32          # 32 rows * 128 lanes = 4096 elems = 4 f32 vregs per value
TM_MAX = 8192            # rows per tile -> 8192*128*4B = 4 MiB per f32 input block
VMEM_LIMIT = 48 * 1024 * 1024   # explicit scoped-VMEM limit (safe on v5e/v6e/v7x)


def _round_up(a, b):
    return ((a + b - 1) // b) * b


def _round_down(a, b):
    return (a // b) * b


def _cdiv(a, b):
    return (a + b - 1) // b


def _choose_tiling(n_rows):
    """Pick (tm, chunk, n_tiles).  tm is a multiple of chunk; aim for >= ~3
    grid steps so the BlockSpec pipeline overlaps DMA with compute."""
    if n_rows <= CHUNK_ROWS:
        chunk = 8
        tm = max(8, _round_up(n_rows, 8))
    else:
        chunk = CHUNK_ROWS
        tm = min(TM_MAX, max(chunk, _round_down(n_rows // 3, chunk)))
    return tm, chunk, _cdiv(n_rows, tm)


def _bce_dice_sums_kernel(x_ref, t_ref, out_ref, *, tm, chunk, n_valid_rows):
    """Accumulate (8,128) partial sums of [bce_elem, sigmoid(x), t, sigmoid(x)*t].

    The (tm, 128) block is walked in `chunk`-row pieces so every intermediate
    of the exp/sigmoid/BCE chain stays in a handful of vregs (no whole-block
    VMEM temporaries).  out_ref (4, 8, 128) is a resident accumulator across
    the grid's reduction axis.
    """
    i = pl.program_id(0)

    @pl.when(i == 0)
    def _init():
        out_ref[...] = jnp.zeros_like(out_ref)

    n_chunks = tm // chunk
    cr = chunk // 8
    # Static: only emit the row-mask code when the tile does not divide evenly.
    masked = (n_valid_rows % tm) != 0

    if masked:
        row_iota = lax.broadcasted_iota(jnp.int32, (chunk, LANES), 0)
        valid_rows_in_block = n_valid_rows - i * tm     # traced i32 scalar

    def body(c, accs):
        bce_acc, pred_acc, tgt_acc, inter_acc = accs
        r0 = pl.multiple_of(c * chunk, chunk)
        x = x_ref[pl.ds(r0, chunk), :].astype(jnp.float32)
        t = t_ref[pl.ds(r0, chunk), :].astype(jnp.float32)
        if masked:
            # Select BEFORE any math: out-of-bounds rows of the boundary block
            # hold unspecified bits.  x -> -1e4 (never -inf: -inf*0 = NaN) and
            # t -> 0 contribute exactly 0 to all four sums.
            valid = row_iota < (valid_rows_in_block - c * chunk)
            x = jnp.where(valid, x, jnp.float32(-1e4))
            t = jnp.where(valid, t, jnp.float32(0.0))

        # One exp shared between sigmoid and the stable BCE-with-logits formula.
        e = jnp.exp(-jnp.abs(x))
        inv = 1.0 / (1.0 + e)                     # exact; kernel is HBM-bound
        pred = jnp.where(x >= 0, inv, e * inv)    # == sigmoid(x)
        bce = jnp.log1p(e) + jnp.maximum(x, 0.0) - x * t

        bce_acc = bce_acc + bce.reshape(cr, 8, LANES).sum(axis=0)
        pred_acc = pred_acc + pred.reshape(cr, 8, LANES).sum(axis=0)
        tgt_acc = tgt_acc + t.reshape(cr, 8, LANES).sum(axis=0)
        inter_acc = inter_acc + (pred * t).reshape(cr, 8, LANES).sum(axis=0)
        return bce_acc, pred_acc, tgt_acc, inter_acc

    z = jnp.zeros((8, LANES), jnp.float32)
    bce_s, pred_s, tgt_s, inter_s = lax.fori_loop(0, n_chunks, body, (z, z, z, z))

    out_ref[0, :, :] += bce_s
    out_ref[1, :, :] += pred_s
    out_ref[2, :, :] += tgt_s
    out_ref[3, :, :] += inter_s


def _partial_sums(logits, target):
    assert logits.shape == target.shape
    n_total = int(logits.size)

    # Keep native dtypes (bf16 logits halve HBM traffic); widen in-kernel.
    x = logits.reshape(-1)
    t = target.reshape(-1)

    rem = n_total % LANES
    if rem:
        # Rare fallback: flattened size is not a multiple of 128, so the
        # lane-dense (rows, 128) view cannot exist without a small pad.
        # Padded logits = -1e4, targets = 0 -> exactly 0 contribution to all
        # four sums.  TODO(synk): make this copy-free with BoundedSlice specs.
        pad = LANES - rem
        x = jnp.concatenate([x, jnp.full((pad,), -1e4, x.dtype)])
        t = jnp.concatenate([t, jnp.zeros((pad,), t.dtype)])

    n_rows = x.shape[0] // LANES          # static Python int
    x2 = x.reshape(n_rows, LANES)
    t2 = t.reshape(n_rows, LANES)

    tm, chunk, n_tiles = _choose_tiling(n_rows)

    kernel = functools.partial(
        _bce_dice_sums_kernel, tm=tm, chunk=chunk, n_valid_rows=n_rows)

    in_bytes = x2.size * x2.dtype.itemsize + t2.size * t2.dtype.itemsize
    partials = pl.pallas_call(
        kernel,
        out_shape=jax.ShapeDtypeStruct((4, 8, LANES), jnp.float32),
        grid_spec=pltpu.PrefetchScalarGridSpec(
            num_scalar_prefetch=0,
            grid=(n_tiles,),
            in_specs=[
                pl.BlockSpec((tm, LANES), lambda i: (i, 0)),
                pl.BlockSpec((tm, LANES), lambda i: (i, 0)),
            ],
            out_specs=pl.BlockSpec((4, 8, LANES), lambda i: (0, 0, 0)),
        ),
        compiler_params=pltpu.CompilerParams(
            dimension_semantics=("arbitrary",),
            vmem_limit_bytes=VMEM_LIMIT),
        cost_estimate=pl.CostEstimate(
            flops=12 * n_total,
            transcendentals=3 * n_total,
            bytes_accessed=in_bytes + 4 * 8 * LANES * 4),
    )(x2, t2)

    sums = jnp.sum(partials, axis=(1, 2))   # (4,) — tiny final reduction
    return sums, n_total


@jax.jit
def bce_dice_loss(logits, target, w_bce=0.5, w_dice=0.5):
    """Matches BCEDiceLoss.forward (bce_weight=None, mean-reduced BCE)."""
    sums, n_total = _partial_sums(logits, target)
    bce_sum, pred_sum, tgt_sum, inter_sum = sums[0], sums[1], sums[2], sums[3]
    eps = 1.0
    bce = bce_sum / jnp.float32(n_total)
    dice = 1.0 - (2.0 * inter_sum + eps) / (pred_sum + tgt_sum + eps)
    # TODO(synk): the PyTorch module also appends bce/dice to self.hist; pure
    # host-side Python logging with no Pallas equivalent, omitted.
    return w_bce * bce + w_dice * dice


def _reference(logits, target, w_bce=0.5, w_dice=0.5):
    pred = jax.nn.sigmoid(logits)
    bce_elem = (jnp.maximum(logits, 0.0) - logits * target
                + jnp.log1p(jnp.exp(-jnp.abs(logits))))
    bce = jnp.mean(bce_elem)
    inter = jnp.sum(pred * target)
    dice = 1.0 - (2.0 * inter + 1.0) / (jnp.sum(pred) + jnp.sum(target) + 1.0)
    return w_bce * bce + w_dice * dice


if __name__ == "__main__":
    key = jax.random.PRNGKey(0)
    k1, k2, k3, k4, k5, k6 = jax.random.split(key, 6)

    # Primary NCHW case (lane-aligned: single clean tile, no masking, no pad).
    x = jax.random.normal(k1, (2, 4, 16, 16), dtype=jnp.float32)        # logits
    tgt = (jax.random.uniform(k2, (2, 4, 16, 16)) > 0.5).astype(jnp.float32)
    loss = jax.block_until_ready(bce_dice_loss(x, tgt))
    ref = _reference(x, tgt)
    assert jnp.allclose(loss, ref, rtol=5e-4, atol=5e-4), (loss, ref)

    # Multi-tile case whose row count (72) does not divide the tile (32):
    # exercises multi-step accumulation + in-kernel masking of the final block.
    x2 = jax.random.normal(k3, (1, 2, 72, 64), dtype=jnp.float32)
    t2 = (jax.random.uniform(k4, (1, 2, 72, 64)) > 0.5).astype(jnp.float32)
    loss2 = jax.block_until_ready(bce_dice_loss(x2, t2))
    ref2 = _reference(x2, t2)
    assert jnp.allclose(loss2, ref2, rtol=5e-4, atol=5e-4), (loss2, ref2)

    # Non-128-divisible size (780 elems): exercises the rare pad fallback.
    x3 = jax.random.normal(k5, (2, 3, 10, 13), dtype=jnp.float32)
    t3 = (jax.random.uniform(k6, (2, 3, 10, 13)) > 0.5).astype(jnp.float32)
    loss3 = jax.block_until_ready(bce_dice_loss(x3, t3))
    ref3 = _reference(x3, t3)
    assert jnp.allclose(loss3, ref3, rtol=5e-4, atol=5e-4), (loss3, ref3)

    print("KERNEL_OK")
</pallas_src>

<mosaic_0001>
module attributes {stable_mosaic.version = 11 : i64} {
  func.func @_bce_dice_sums_kernel(%arg0: i32, %arg1: memref<16x128xf32, #tpu.memory_space<vmem>>, %arg2: memref<16x128xf32, #tpu.memory_space<vmem>>, %arg3: memref<4x8x128xf32, #tpu.memory_space<vmem>>) attributes {dimension_semantics = [#tpu.dimension_semantics<arbitrary>], iteration_bounds = array<i64: 1>, scalar_prefetch = 0 : i64, scratch_operands = 0 : i64, tpu.core_type = #tpu.core_type<tc>, window_params = [{transform_indices = @transform_0, window_bounds = array<i64: 16, 128>}, {transform_indices = @transform_1, window_bounds = array<i64: 16, 128>}, {pipeline_mode = #tpu.pipeline_mode<synchronous>, transform_indices = @transform_2, window_bounds = array<i64: 4, 8, 128>}]} {
    %c0_i32 = arith.constant 0 : i32
    %0 = arith.cmpi eq, %arg0, %c0_i32 : i32
    %1 = arith.extui %0 : i1 to i32
    %c0_i32_0 = arith.constant 0 : i32
    %2 = arith.cmpi ne, %1, %c0_i32_0 : i32
    scf.if %2 {
      %cst_23 = arith.constant 0.000000e+00 : f32
      %30 = vector.broadcast %cst_23 : f32 to vector<4x8x128xf32>
      %c0_24 = arith.constant 0 : index
      %c0_25 = arith.constant 0 : index
      %c0_26 = arith.constant 0 : index
      %31 = vector.load %arg3[%c0_24, %c0_25, %c0_26] : memref<4x8x128xf32, #tpu.memory_space<vmem>>, vector<4x8x128xf32>
      tpu.vector_store %arg3[%c0_24, %c0_25, %c0_26], %30 {strides = array<i32>} : memref<4x8x128xf32, #tpu.memory_space<vmem>>, vector<4x8x128xf32>,
    } else {
    }
    %cst = arith.constant 0.000000e+00 : f32
    %3 = vector.broadcast %cst : f32 to vector<8x128xf32>
    %c0_i32_1 = arith.constant 0 : i32
    %c2_i32 = arith.constant 2 : i32
    %4 = arith.addi %c0_i32_1, %c2_i32 : i32
    %c1_i32 = arith.constant 1 : i32
    %5:4 = scf.for %arg4 = %c0_i32_1 to %4 step %c1_i32 iter_args(%arg5 = %3, %arg6 = %3, %arg7 = %3, %arg8 = %3) -> (vector<8x128xf32>, vector<8x128xf32>, vector<8x128xf32>, vector<8x128xf32>)  : i32 {
      %c8_i32 = arith.constant 8 : i32
      %30 = arith.muli %arg4, %c8_i32 : i32
      %31 = tpu.assume_multiple %30, 8 : i32
      %32 = arith.index_cast %31 : i32 to index
      %c0_23 = arith.constant 0 : index
      %33 = vector.load %arg1[%32, %c0_23] : memref<16x128xf32, #tpu.memory_space<vmem>>, vector<8x128xf32>
      %34 = arith.index_cast %31 : i32 to index
      %c0_24 = arith.constant 0 : index
      %35 = vector.load %arg2[%34, %c0_24] : memref<16x128xf32, #tpu.memory_space<vmem>>, vector<8x128xf32>
      %36 = math.absf %33 : vector<8x128xf32>
      %cst_25 = arith.constant 0.000000e+00 : f32
      %37 = vector.broadcast %cst_25 : f32 to vector<8x128xf32>
      %38 = arith.subf %37, %36 : vector<8x128xf32>
      %39 = math.exp %38 : vector<8x128xf32>
      %cst_26 = arith.constant 1.000000e+00 : f32
      %40 = vector.broadcast %cst_26 : f32 to vector<8x128xf32>
      %41 = arith.addf %40, %39 : vector<8x128xf32>
      %cst_27 = arith.constant 1.000000e+00 : f32
      %42 = vector.broadcast %cst_27 : f32 to vector<8x128xf32>
      %43 = arith.divf %42, %41 : vector<8x128xf32>
      %cst_28 = arith.constant 0.000000e+00 : f32
      %44 = vector.broadcast %cst_28 : f32 to vector<8x128xf32>
      %45 = arith.cmpf oge, %33, %44 : vector<8x128xf32>
      %46 = arith.mulf %39, %43 : vector<8x128xf32>
      %47 = arith.select %45, %43, %46 : vector<8x128xi1>, vector<8x128xf32>
      %48 = math.log1p %39 : vector<8x128xf32>
      %cst_29 = arith.constant 0.000000e+00 : f32
      %49 = vector.broadcast %cst_29 : f32 to vector<8x128xf32>
      %50 = arith.maximumf %33, %49 : vector<8x128xf32>
      %51 = arith.addf %48, %50 : vector<8x128xf32>
      %52 = arith.mulf %33, %35 : vector<8x128xf32>
      %53 = arith.subf %51, %52 : vector<8x128xf32>
      %54 = vector.shape_cast %53 : vector<8x128xf32> to vector<1x8x128xf32>
      %cst_30 = arith.constant dense<0.000000e+00> : vector<8x128xf32>
      %55 = vector.multi_reduction <add>, %54, %cst_30 [0] : vector<1x8x128xf32> to vector<8x128xf32>
      %56 = arith.addf %arg5, %55 : vector<8x128xf32>
      %57 = vector.shape_cast %47 : vector<8x128xf32> to vector<1x8x128xf32>
      %cst_31 = arith.constant dense<0.000000e+00> : vector<8x128xf32>
      %58 = vector.multi_reduction <add>, %57, %cst_31 [0] : vector<1x8x128xf32> to vector<8x128xf32>
      %59 = arith.addf %arg6, %58 : vector<8x128xf32>
      %60 = vector.shape_cast %35 : vector<8x128xf32> to vector<1x8x128xf32>
      %cst_32 = arith.constant dense<0.000000e+00> : vector<8x128xf32>
      %61 = vector.multi_reduction <add>, %60, %cst_32 [0] : vector<1x8x128xf32> to vector<8x128xf32>
      %62 = arith.addf %arg7, %61 : vector<8x128xf32>
      %63 = arith.mulf %47, %35 : vector<8x128xf32>
      %64 = vector.shape_cast %63 : vector<8x128xf32> to vector<1x8x128xf32>
      %cst_33 = arith.constant dense<0.000000e+00> : vector<8x128xf32>
      %65 = vector.multi_reduction <add>, %64, %cst_33 [0] : vector<1x8x128xf32> to vector<8x128xf32>
      %66 = arith.addf %arg8, %65 : vector<8x128xf32>
      scf.yield %56, %59, %62, %66 : vector<8x128xf32>, vector<8x128xf32>, vector<8x128xf32>, vector<8x128xf32>
    }
    %c2_i32_2 = arith.constant 2 : i32
    %c0 = arith.constant 0 : index
    %c0_3 = arith.constant 0 : index
    %c0_4 = arith.constant 0 : index
    %6 = vector.load %arg3[%c0, %c0_3, %c0_4] : memref<4x8x128xf32, #tpu.memory_space<vmem>>, vector<1x8x128xf32>
    %7 = vector.shape_cast %6 : vector<1x8x128xf32> to vector<8x128xf32>
    %8 = arith.addf %7, %5#0 : vector<8x128xf32>
    %c0_5 = arith.constant 0 : index
    %c0_6 = arith.constant 0 : index
    %c0_7 = arith.constant 0 : index
    %9 = vector.load %arg3[%c0_5, %c0_6, %c0_7] : memref<4x8x128xf32, #tpu.memory_space<vmem>>, vector<1x8x128xf32>
    %10 = vector.shape_cast %9 : vector<1x8x128xf32> to vector<8x128xf32>
    %11 = vector.shape_cast %8 : vector<8x128xf32> to vector<1x8x128xf32>
    tpu.vector_store %arg3[%c0_5, %c0_6, %c0_7], %11 {strides = array<i32>} : memref<4x8x128xf32, #tpu.memory_space<vmem>>, vector<1x8x128xf32>,
    %c1 = arith.constant 1 : index
    %c0_8 = arith.constant 0 : index
    %c0_9 = arith.constant 0 : index
    %12 = vector.load %arg3[%c1, %c0_8, %c0_9] : memref<4x8x128xf32, #tpu.memory_space<vmem>>, vector<1x8x128xf32>
    %13 = vector.shape_cast %12 : vector<1x8x128xf32> to vector<8x128xf32>
    %14 = arith.addf %13, %5#1 : vector<8x128xf32>
    %c1_10 = arith.constant 1 : index
    %c0_11 = arith.constant 0 : index
    %c0_12 = arith.constant 0 : index
    %15 = vector.load %arg3[%c1_10, %c0_11, %c0_12] : memref<4x8x128xf32, #tpu.memory_space<vmem>>, vector<1x8x128xf32>
    %16 = vector.shape_cast %15 : vector<1x8x128xf32> to vector<8x128xf32>
    %17 = vector.shape_cast %14 : vector<8x128xf32> to vector<1x8x128xf32>
    tpu.vector_store %arg3[%c1_10, %c0_11, %c0_12], %17 {strides = array<i32>} : memref<4x8x128xf32, #tpu.memory_space<vmem>>, vector<1x8x128xf32>,
    %c2 = arith.constant 2 : index
    %c0_13 = arith.constant 0 : index
    %c0_14 = arith.constant 0 : index
    %18 = vector.load %arg3[%c2, %c0_13, %c0_14] : memref<4x8x128xf32, #tpu.memory_space<vmem>>, vector<1x8x128xf32>
    %19 = vector.shape_cast %18 : vector<1x8x128xf32> to vector<8x128xf32>
    %20 = arith.addf %19, %5#2 : vector<8x128xf32>
    %c2_15 = arith.constant 2 : index
    %c0_16 = arith.constant 0 : index
    %c0_17 = arith.constant 0 : index
    %21 = vector.load %arg3[%c2_15, %c0_16, %c0_17] : memref<4x8x128xf32, #tpu.memory_space<vmem>>, vector<1x8x128xf32>
    %22 = vector.shape_cast %21 : vector<1x8x128xf32> to vector<8x128xf32>
    %23 = vector.shape_cast %20 : vector<8x128xf32> to vector<1x8x128xf32>
    tpu.vector_store %arg3[%c2_15, %c0_16, %c0_17], %23 {strides = array<i32>} : memref<4x8x128xf32, #tpu.memory_space<vmem>>, vector<1x8x128xf32>,
    %c3 = arith.constant 3 : index
    %c0_18 = arith.constant 0 : index
    %c0_19 = arith.constant 0 : index
    %24 = vector.load %arg3[%c3, %c0_18, %c0_19] : memref<4x8x128xf32, #tpu.memory_space<vmem>>, vector<1x8x128xf32>
    %25 = vector.shape_cast %24 : vector<1x8x128xf32> to vector<8x128xf32>
    %26 = arith.addf %25, %5#3 : vector<8x128xf32>
    %c3_20 = arith.constant 3 : index
    %c0_21 = arith.constant 0 : index
    %c0_22 = arith.constant 0 : index
    %27 = vector.load %arg3[%c3_20, %c0_21, %c0_22] : memref<4x8x128xf32, #tpu.memory_space<vmem>>, vector<1x8x128xf32>
    %28 = vector.shape_cast %27 : vector<1x8x128xf32> to vector<8x128xf32>
    %29 = vector.shape_cast %26 : vector<8x128xf32> to vector<1x8x128xf32>
    tpu.vector_store %arg3[%c3_20, %c0_21, %c0_22], %29 {strides = array<i32>} : memref<4x8x128xf32, #tpu.memory_space<vmem>>, vector<1x8x128xf32>,
    return
  }
  func.func @transform_0(%arg0: i32) -> (i32, i32) {
    %c0_i32 = arith.constant 0 : i32
    %c0_i32_0 = arith.constant 0 : i32
    return %arg0, %c0_i32 : i32, i32
  }
  func.func @transform_1(%arg0: i32) -> (i32, i32) {
    %c0_i32 = arith.constant 0 : i32
    %c0_i32_0 = arith.constant 0 : i32
    return %arg0, %c0_i32 : i32, i32
  }
  func.func @transform_2(%arg0: i32) -> (i32, i32, i32) {
    %c0_i32 = arith.constant 0 : i32
    %c0_i32_0 = arith.constant 0 : i32
    %c0_i32_1 = arith.constant 0 : i32
    %c0_i32_2 = arith.constant 0 : i32
    return %c0_i32, %c0_i32_0, %c0_i32_1 : i32, i32, i32
  }
}

</mosaic_0001>

<bundles_post_ra>
// kernel: bce_dice_loss.1
= control target key start
LH: loop header
LB: loop body
LE: loop exit
PB: predicated region body
PF: predicated region fallthrough
CT: control target
= control target key end

     0   :  { %v200_v0 = vmov 0.0   ;;  %v180_v1 = vmov 0.0   ;;  %v184_v2 = vmov 0.0   ;;  %v188_v3 = vmov 0.0   ;;  %s228_s17 = smov 0   ;;  %s267_s0 = inlined_call_operand.vmem [shape: f32[16,128], index: 0, kind: input, shape index: {}]   ;;  %s268_s1 = inlined_call_operand.vmem [shape: f32[16,128], index: 1, kind: input, shape index: {}]   ;;  %s269_s2 = inlined_call_operand.vmem [shape: f32[4,8,128], index: 2, kind: output, shape index: {}]  }
   0x1   :  { %15 = vst [vmem:[%s269_s2] sm:$0xff] %v200_v0  ;;  %16 = vst [vmem:[%s269_s2 + $0x8] sm:$0xff] %v200_v0  ;;  %v192_v4 = vmov 0.0  }
   0x2   :  { %17 = vst [vmem:[%s269_s2 + $0x10] sm:$0xff] %v200_v0  ;;  %18 = vst [vmem:[%s269_s2 + $0x18] sm:$0xff] %v200_v0 }
   0x3 LB: > { %s106_s18 = sshll.u32 %s198_s17, 3  ;;  %s24_s17 = sadd.s32 1, %s198_s17   ;;  %s198_s17 = sphi %s228_s17, %s24_s17   ;;  %v194_v4 = vphi %v192_v4, %v193_v4   ;;  %v190_v3 = vphi %v188_v3, %v189_v3   ;;  %v186_v2 = vphi %v184_v2, %v185_v2   ;;  %v182_v1 = vphi %v180_v1, %v181_v1  }
   0x4   : > { %s30_s21 = scalar_lea.vmem %s267_s0, %s106_s18  ;;  %s32_s24 = scalar_lea.vmem %s268_s1, %s106_s18 }
   0x5   : > { %v31_v5 = vld [vmem:[%s30_s21] sm:$0xff]  ;;  %p21_p0 = scmp.ge.s32.totalorder %s24_s17, 2  }
   0x6   : > { %v33_v6 = vld [vmem:[%s32_s24] sm:$0xff]  ;;  %v34_v7 = vand.u32 2147483647, %v31_v5  ;;  %vm41_vm0 = vcmp.ge.f32.partialorder %v31_v5, 0.0  ;;  %v53_v20 = vmax.f32 %v31_v5, 0.0 }
   0x7   : > { %v62_v8 = vadd.f32 %v186_v2, %v33_v6   ;;  %v55_v23 = vmul.f32 %v33_v6, %v31_v5 }
   0x8   : > { %v35_v9 = vsub.f32 0.0, %v34_v7  ;;  %v66_v31 = vld [vmem:[%s269_s2] sm:$0xff] (%p21_p0)  ;;  %v107_v32 = vld [vmem:[%s269_s2 + $0x8] sm:$0xff] (%p21_p0) }
   0x9   : > { %v185_v2 = vmov %v62_v8   ;;  %v109_v33 = vld [vmem:[%s269_s2 + $0x10] sm:$0xff] (%p21_p0)  ;;  %v111_v37 = vld [vmem:[%s269_s2 + $0x18] sm:$0xff] (%p21_p0) }
   0xa   : > { %v36_v10 = vmul.f32 1.442695, %v35_v9  ;;  %v75_v36 = vadd.f32 (%p21_p0), %v109_v33, %v62_v8 }
   0xc   : > { %154 = vpow2.f32 %v36_v10  ;;  %110 = vst [vmem:[%s269_s2 + $0x10] sm:$0xff] (%p21_p0), %v75_v36 }
  0x16   : > { %v155_v11 = vpop.eup %154 }
  0x17   : > { %v38_v12 = vadd.f32 1.0, %v155_v11  ;;  %v47_v13 = vmul.f32 -0.5, %v155_v11  ;;  %v50_v15 = vand.u32 2147483647, %v155_v11 }
  0x19   : > { %156 = vrcp.f32 %v38_v12  ;;  %v48_v14 = vadd.f32 1.0, %v47_v13  ;;  %vm51_vm1 = vcmp.lt.f32.partialorder %v50_v15, 0.0004427343 }
  0x1a   : > { %158 = vlog2.f32 %v38_v12 }
  0x1b   : > { %v49_v17 = vmul.f32 %v155_v11, %v48_v14 }
  0x23   : > { %v157_v16 = vpop.eup %156 }
  0x24   : > { %v159_v18 = vpop.eup %158  ;;  %v42_v19 = vmul.f32 %v157_v16, %v155_v11 }
  0x25   : > { %v46_v21 = vmul.f32 0.6931472, %v159_v18 }
  0x26   : > { %v43_v22 = vsel %vm41_vm0, %v157_v16, %v42_v19 }
  0x27   : > { %v52_v24 = vsel %vm51_vm1, %v49_v17, %v46_v21  ;;  %v60_v25 = vadd.f32 %v190_v3, %v43_v22   ;;  %v63_v26 = vmul.f32 %v43_v22, %v33_v6 }
  0x28   : > { %v54_v27 = vadd.f32 %v53_v20, %v52_v24  ;;  %23 = sbr.rel (!%p21_p0) target bundleno = 3 (0x3), region = 44 }
  0x29   : > { %v65_v28 = vadd.f32 %v182_v1, %v63_v26   ;;  %v189_v3 = vmov %v60_v25   ;;  %v71_v35 = vadd.f32 (%p21_p0), %v107_v32, %v60_v25 }
  0x2a   : > { %v56_v29 = vsub.f32 %v54_v27, %v55_v23 }
  0x2b   : > { %v181_v1 = vmov %v65_v28   ;;  %v79_v38 = vadd.f32 (%p21_p0), %v111_v37, %v65_v28  ;;  %108 = vst [vmem:[%s269_s2 + $0x8] sm:$0xff] (%p21_p0), %v71_v35 }
  0x2c   : > { %v58_v30 = vadd.f32 %v194_v4, %v56_v29  }
  0x2d   :  { %112 = vst [vmem:[%s269_s2 + $0x18] sm:$0xff] (%p21_p0), %v79_v38 }
  0x2e   : > { %v193_v4 = vmov %v58_v30   ;;  %v67_v34 = vadd.f32 (%p21_p0), %v66_v31, %v58_v30 }
  0x30   :  { %68 = vst [vmem:[%s269_s2] sm:$0xff] %v67_v34 }

</bundles_post_ra>
